<compile_context>
chip_gen: v7x
topology: tpu7x:2x2x1
jax: 0.10.0
libtpu: 0.0.40
codegen_flags: <defaults>
</compile_context>

<pallas_src>
import functools

import jax
import jax.numpy as jnp
from jax.experimental import pallas as pl
from jax.experimental.pallas import tpu as pltpu

_LANE = 128


def _coral_loss_kernel(logits_ref, labels_ref, out_ref, *, n_valid, inv_denom):
    """One grid step: add this batch-tile's BCE-with-logits sum into the accumulator."""
    i = pl.program_id(0)

    @pl.when(i == 0)
    def _init():
        out_ref[0, 0] = jnp.float32(0.0)

    x = logits_ref[...].astype(jnp.float32)   # (K, TILE_B), upcast in-kernel
    lab = labels_ref[...]                     # (1, TILE_B) int32
    k_dim, tile_b = x.shape

    # labels_bin[k, b] = (labels[b] > k)
    thresh = jax.lax.broadcasted_iota(jnp.int32, (k_dim, tile_b), dimension=0)
    y = (lab > thresh).astype(jnp.float32)

    # Numerically-stable BCE with logits (same as torch.nn.BCEWithLogitsLoss).
    per_elem = jnp.maximum(x, 0.0) - x * y + jnp.log1p(jnp.exp(-jnp.abs(x)))

    # Mask padded batch lanes (only emitted when B was padded up to the tile size).
    if n_valid is not None:
        col = jax.lax.broadcasted_iota(jnp.int32, (k_dim, tile_b), dimension=1) + i * tile_b
        per_elem = jnp.where(col < n_valid, per_elem, 0.0)

    out_ref[0, 0] += jnp.sum(per_elem)

    @pl.when(i == pl.num_programs(0) - 1)
    def _finalize():
        out_ref[0, 0] = out_ref[0, 0] * jnp.float32(inv_denom)


def coral_ordinal_loss(logits: jax.Array, labels: jax.Array, *, tile_b: int = 32768) -> jax.Array:
    """logits: (B, num_classes-1) float; labels: (B,) int -> scalar mean BCE loss."""
    B, K = logits.shape

    # Lane-dense layout: batch on the lane (last) axis.
    logits_t = logits.T                                    # (K, B)
    labels_row = labels.reshape(1, B).astype(jnp.int32)    # (1, B)

    # Lane-align the batch tile and pad B up to a multiple of it.
    tile_b = max(_LANE, (min(tile_b, B) + _LANE - 1) // _LANE * _LANE)
    b_pad = (B + tile_b - 1) // tile_b * tile_b
    if b_pad != B:
        logits_t = jnp.pad(logits_t, ((0, 0), (0, b_pad - B)))
        labels_row = jnp.pad(labels_row, ((0, 0), (0, b_pad - B)))
    n_tiles = b_pad // tile_b

    kernel = functools.partial(
        _coral_loss_kernel,
        n_valid=B if b_pad != B else None,
        inv_denom=1.0 / float(B * K),
    )

    cost = pl.CostEstimate(
        flops=6 * B * K,
        transcendentals=2 * B * K,
        bytes_accessed=B * K * logits.dtype.itemsize + B * 4 + 4,
    )

    out = pl.pallas_call(
        kernel,
        out_shape=jax.ShapeDtypeStruct((1, 1), jnp.float32),
        grid=(n_tiles,),
        in_specs=[
            pl.BlockSpec((K, tile_b), lambda i: (0, i)),   # logits tile (K, TILE_B)
            pl.BlockSpec((1, tile_b), lambda i: (0, i)),   # labels tile (1, TILE_B)
        ],
        out_specs=pl.BlockSpec((1, 1), lambda i: (0, 0), memory_space=pltpu.SMEM),
        compiler_params=pltpu.CompilerParams(dimension_semantics=("arbitrary",)),
        cost_estimate=cost,
    )(logits_t, labels_row)
    return out[0, 0]


def _reference_loss(logits, labels):
    """Pure-JAX reference mirroring the PyTorch module."""
    B, K = logits.shape
    x = logits.astype(jnp.float32)
    thresh = jnp.arange(K)[None, :]
    y = (labels[:, None] > thresh).astype(jnp.float32)
    per_elem = jnp.maximum(x, 0.0) - x * y + jnp.log1p(jnp.exp(-jnp.abs(x)))
    return jnp.mean(per_elem)


if __name__ == "__main__":
    num_classes = 5          # -> K = 4 ordinal thresholds
    K = num_classes - 1
    key = jax.random.PRNGKey(0)

    # Small test (single tile, padded batch lanes masked).
    B = 8
    k_logits, k_labels, key = jax.random.split(key, 3)
    logits = jax.random.normal(k_logits, (B, K), dtype=jnp.float32)
    labels = jax.random.randint(k_labels, (B,), 0, num_classes, dtype=jnp.int32)

    loss = coral_ordinal_loss(logits, labels)
    jax.block_until_ready(loss)
    ref = _reference_loss(logits, labels)
    assert jnp.allclose(loss, ref, rtol=1e-5, atol=1e-6), (loss, ref)

    # Multi-tile test: exercises grid accumulation + tail-tile masking.
    B2 = 300
    k_logits2, k_labels2 = jax.random.split(key)
    logits2 = jax.random.normal(k_logits2, (B2, K), dtype=jnp.float32)
    labels2 = jax.random.randint(k_labels2, (B2,), 0, num_classes, dtype=jnp.int32)

    loss2 = coral_ordinal_loss(logits2, labels2, tile_b=128)
    jax.block_until_ready(loss2)
    ref2 = _reference_loss(logits2, labels2)
    assert jnp.allclose(loss2, ref2, rtol=1e-5, atol=1e-6), (loss2, ref2)

    print("KERNEL_OK")
</pallas_src>

<mosaic_0001>
module attributes {stable_mosaic.version = 11 : i64} {
  func.func @_coral_loss_kernel(%arg0: i32, %arg1: memref<4x128xf32, #tpu.memory_space<vmem>>, %arg2: memref<1x128xi32, #tpu.memory_space<vmem>>, %arg3: memref<1x1xf32, #tpu.memory_space<smem>>) attributes {dimension_semantics = [#tpu.dimension_semantics<arbitrary>], iteration_bounds = array<i64: 1>, scalar_prefetch = 0 : i64, scratch_operands = 0 : i64, tpu.core_type = #tpu.core_type<tc>, window_params = [{transform_indices = @transform_0, window_bounds = array<i64: 4, 128>}, {transform_indices = @transform_1, window_bounds = array<i64: 1, 128>}, {transform_indices = @transform_2, window_bounds = array<i64: 1, 1>}]} {
    %c0_i32 = arith.constant 0 : i32
    %0 = arith.cmpi eq, %arg0, %c0_i32 : i32
    %1 = arith.extui %0 : i1 to i32
    %c0_i32_0 = arith.constant 0 : i32
    %2 = arith.cmpi ne, %1, %c0_i32_0 : i32
    scf.if %2 {
      %cst_13 = arith.constant 0.000000e+00 : f32
      %c0_14 = arith.constant 0 : index
      %c0_15 = arith.constant 0 : index
      %38 = memref.load %arg3[%c0_14, %c0_15] : memref<1x1xf32, #tpu.memory_space<smem>>
      memref.store %cst_13, %arg3[%c0_14, %c0_15] : memref<1x1xf32, #tpu.memory_space<smem>>
    } else {
    }
    %c0 = arith.constant 0 : index
    %c0_1 = arith.constant 0 : index
    %3 = vector.load %arg1[%c0, %c0_1] : memref<4x128xf32, #tpu.memory_space<vmem>>, vector<4x128xf32>
    %c0_2 = arith.constant 0 : index
    %c0_3 = arith.constant 0 : index
    %4 = vector.load %arg2[%c0_2, %c0_3] : memref<1x128xi32, #tpu.memory_space<vmem>>, vector<1x128xi32>
    %5 = tpu.iota {dimensions = array<i32: 0>} : vector<4x128xi32>
    %6 = vector.broadcast %4 : vector<1x128xi32> to vector<4x128xi32>
    %7 = arith.cmpi sgt, %6, %5 : vector<4x128xi32>
    %8 = arith.extui %7 : vector<4x128xi1> to vector<4x128xi32>
    %9 = arith.sitofp %8 : vector<4x128xi32> to vector<4x128xf32>
    %cst = arith.constant 0.000000e+00 : f32
    %10 = vector.broadcast %cst : f32 to vector<4x128xf32>
    %11 = arith.maximumf %3, %10 : vector<4x128xf32>
    %12 = arith.mulf %3, %9 : vector<4x128xf32>
    %13 = arith.subf %11, %12 : vector<4x128xf32>
    %14 = math.absf %3 : vector<4x128xf32>
    %cst_4 = arith.constant 0.000000e+00 : f32
    %15 = vector.broadcast %cst_4 : f32 to vector<4x128xf32>
    %16 = arith.subf %15, %14 : vector<4x128xf32>
    %17 = math.exp %16 : vector<4x128xf32>
    %18 = math.log1p %17 : vector<4x128xf32>
    %19 = arith.addf %13, %18 : vector<4x128xf32>
    %20 = tpu.iota {dimensions = array<i32: 1>} : vector<4x128xi32>
    %c128_i32 = arith.constant 128 : i32
    %21 = arith.muli %arg0, %c128_i32 : i32
    %22 = vector.broadcast %21 : i32 to vector<4x128xi32>
    %23 = arith.addi %20, %22 : vector<4x128xi32>
    %c8_i32 = arith.constant 8 : i32
    %24 = vector.broadcast %c8_i32 : i32 to vector<4x128xi32>
    %25 = arith.cmpi slt, %23, %24 : vector<4x128xi32>
    %cst_5 = arith.constant 0.000000e+00 : f32
    %26 = vector.broadcast %cst_5 : f32 to vector<4x128xf32>
    %27 = arith.select %25, %19, %26 : vector<4x128xi1>, vector<4x128xf32>
    %c0_6 = arith.constant 0 : index
    %c0_7 = arith.constant 0 : index
    %28 = memref.load %arg3[%c0_6, %c0_7] : memref<1x1xf32, #tpu.memory_space<smem>>
    %29 = vector.shape_cast %27 : vector<4x128xf32> to vector<1x4x128xf32>
    %cst_8 = arith.constant dense<0.000000e+00> : vector<1xf32>
    %30 = vector.multi_reduction <add>, %29, %cst_8 [1, 2] : vector<1x4x128xf32> to vector<1xf32>
    %31 = vector.shape_cast %30 : vector<1xf32> to vector<1x1x1xf32>
    %32 = vector.extract %31[0, 0, 0] : f32 from vector<1x1x1xf32>
    %33 = arith.addf %28, %32 : f32
    %c0_9 = arith.constant 0 : index
    %c0_10 = arith.constant 0 : index
    %34 = memref.load %arg3[%c0_9, %c0_10] : memref<1x1xf32, #tpu.memory_space<smem>>
    memref.store %33, %arg3[%c0_9, %c0_10] : memref<1x1xf32, #tpu.memory_space<smem>>
    %c0_i32_11 = arith.constant 0 : i32
    %35 = arith.cmpi eq, %arg0, %c0_i32_11 : i32
    %36 = arith.extui %35 : i1 to i32
    %c0_i32_12 = arith.constant 0 : i32
    %37 = arith.cmpi ne, %36, %c0_i32_12 : i32
    scf.if %37 {
      %c0_13 = arith.constant 0 : index
      %c0_14 = arith.constant 0 : index
      %38 = memref.load %arg3[%c0_13, %c0_14] : memref<1x1xf32, #tpu.memory_space<smem>>
      %cst_15 = arith.constant 3.125000e-02 : f32
      %39 = arith.mulf %38, %cst_15 : f32
      %c0_16 = arith.constant 0 : index
      %c0_17 = arith.constant 0 : index
      %40 = memref.load %arg3[%c0_16, %c0_17] : memref<1x1xf32, #tpu.memory_space<smem>>
      memref.store %39, %arg3[%c0_16, %c0_17] : memref<1x1xf32, #tpu.memory_space<smem>>
    } else {
    }
    return
  }
  func.func @transform_0(%arg0: i32) -> (i32, i32) {
    %c0_i32 = arith.constant 0 : i32
    %c0_i32_0 = arith.constant 0 : i32
    return %c0_i32, %arg0 : i32, i32
  }
  func.func @transform_1(%arg0: i32) -> (i32, i32) {
    %c0_i32 = arith.constant 0 : i32
    %c0_i32_0 = arith.constant 0 : i32
    return %c0_i32, %arg0 : i32, i32
  }
  func.func @transform_2(%arg0: i32) -> (i32, i32) {
    %c0_i32 = arith.constant 0 : i32
    %c0_i32_0 = arith.constant 0 : i32
    %c0_i32_1 = arith.constant 0 : i32
    return %c0_i32, %c0_i32_0 : i32, i32
  }
}

</mosaic_0001>

<bundles_post_ra>
// kernel: tpu_custom_call.1
= control target key start
LH: loop header
LB: loop body
LE: loop exit
PB: predicated region body
PF: predicated region fallthrough
CT: control target
= control target key end

     0   :  { %7 = vsyncpa [#allocation3], 0  ;;  %s193_s0 = inlined_call_operand.hbm [shape: f32[4,128], index: 0, kind: input, shape index: {}]   ;;  %s194_s1 = inlined_call_operand.vmem [shape: s32[1,128], index: 1, kind: input, shape index: {}]   ;;  %s195_s2 = inlined_call_operand.hbm [shape: f32[1,1], index: 2, kind: output, shape index: {}]  }
   0x1   :  { %8 = vsyncpa [#allocation4], 0  ;;  %s148_s9 = smov [#allocation2]   ;;  %s112_s13 = scalar_lea.hbm %s193_s0, 64 }
   0x2   :  { %s15_s10 = sshll.u32 %s148_s9, 4  ;;  %p113_p0 = scmp.ne.s32.totalorder %s193_s0, %s112_s13  ;;  %s16_s10 = int_to_ptr.vmem [resolvable:$true] %s15_s10 }
   0x3   :  { %p116_p1 = scmp.lt.u32.totalorder %s112_s13, %s193_s0 }
   0x5   :  { %p118_p2 = pnand %p116_p1, %p113_p0 }
   0x7   :  { %121 = shalt.err (!%p118_p2)
}
   0x8   :  { %s122_s18 = scalar_lea.vmem %s16_s10, 64  ;;  %p127_p4 = scmp.lt.s32.totalorder %s16_s10, %s16_s10 }
   0x9   :  { %p123_p3 = scmp.ne.s32.totalorder %s16_s10, %s122_s18  ;;  %p128_p5 = scmp.lt.s32.totalorder %s122_s18, %s122_s18 }
   0xb   :  { %p129_p6 = por %p128_p5, %p127_p4 }
   0xd   :  { %p130_p7 = pnand %p129_p6, %p123_p3 }
   0xf   :  { %133 = shalt.err (!%p130_p7)
}
  0x10   :  { %18 = dma.hbm_to_vmem [thread:$0]  %s193_s0, 64, %s16_s10, [#allocation3]  }
  0x11   :  { %144 = dma.done.wait [#allocation3], 64  }
  0x12   :  { %145 = vsyncadd [#allocation3], 4294967232  ;;  %v30_v0 = vld [vmem:[#allocation2] sm:$0xf]  ;;  %v32_v4 = vlaneseq  ;;  %v149_v10 = vmov 0.0   ;;  %vm66_vm3 = vcmask 1043456  }
  0x13   :  { %v44_v1 = vand.u32 2147483647, %v30_v0  ;;  %v100_v7 = vld [vmem:[%s194_s1] ss:$0 sm:$0xff]  ;;  %v41_v13 = vmax.f32 %v30_v0, 0.0  ;;  %s134_s25 = scalar_lea.hbm %s195_s2, 16 }
  0x14   :  { %v33_v5 = vshrl.u32 %v32_v4, 7  ;;  %v59_v17 = vand.u32 127, %v32_v4  ;;  %p135_p8 = scmp.ne.s32.totalorder %s195_s2, %s134_s25  ;;  %p138_p9 = scmp.lt.u32.totalorder %s134_s25, %s195_s2 }
  0x15   :  { %v45_v2 = vsub.f32 0.0, %v44_v1 }
  0x16   :  { %vm38_vm0 = vcmp.gt.s32.totalorder %v100_v7, %v33_v5  ;;  %vm63_vm2 = vcmp.lt.s32.totalorder %v59_v17, 8  ;;  %p140_p10 = pnand %p138_p9, %p135_p8 }
  0x17   :  { %v46_v3 = vmul.f32 1.442695, %v45_v2  ;;  %v101_v11 = vsel %vm38_vm0, 1.0, %v149_v10 }
  0x18   :  { %v42_v14 = vmul.f32 %v101_v11, %v30_v0 }
  0x19   :  { %108 = vpow2.f32 %v46_v3 }
  0x1a   :  { %v43_v19 = vsub.f32 %v41_v13, %v42_v14 }
  0x23   :  { %v109_v6 = vpop.eup %108 }
  0x24   :  { %v48_v8 = vadd.f32 1.0, %v109_v6  ;;  %v51_v9 = vmul.f32 -0.5, %v109_v6  ;;  %v54_v15 = vand.u32 2147483647, %v109_v6 }
  0x26   :  { %110 = vlog2.f32 %v48_v8  ;;  %v52_v12 = vadd.f32 1.0, %v51_v9  ;;  %vm55_vm1 = vcmp.lt.f32.partialorder %v54_v15, 0.0004427343 }
  0x28   :  { %v53_v16 = vmul.f32 %v109_v6, %v52_v12 }
  0x30   :  { %v111_v18 = vpop.eup %110 }
  0x31   :  { %v50_v20 = vmul.f32 0.6931472, %v111_v18 }
  0x33   :  { %v56_v21 = vsel %vm55_vm1, %v53_v16, %v50_v20 }
  0x34   :  { %v57_v22 = vadd.f32 %v56_v21, %v43_v19 }
  0x36   :  { %v64_v23 = vsel %vm63_vm2, %v57_v22, 0.0 }
  0x37   :  { %v67_v24 = vsel %vm66_vm3, %v64_v23, 0.0 }
  0x38   :  { %68 = vadd.xlane.f32.xlu0 %v67_v24 }
  0xc5   :  { %v69_v25 = vpop.xlane.xlu0 %68 }
  0xc6   :  { %v70_v26 = vrot.slane %v69_v25, 4 }
  0xc8   :  { %v71_v27 = vadd.f32 %v70_v26, %v69_v25 }
  0xca   :  { %v72_v28 = vrot.slane %v71_v27, 2 }
  0xcc   :  { %v73_v29 = vadd.f32 %v72_v28, %v71_v27 }
  0xce   :  { %v74_v30 = vrot.slane %v73_v29, 1 }
  0xd0   :  { %v75_v31 = vadd.f32 %v74_v30, %v73_v29 }
  0xd2   :  { %102 = vpush %v75_v31 }
 0x103   :  { %s103_s0 = spop %102 }
 0x104   :  { %s84_s1 = smul.f32 0.03125, %s103_s0 }
 0x106   :  { %85 = sst [smem:[#allocation5]] %s84_s1 }
 0x107   :  { %143 = shalt.err (!%p140_p10)
}
 0x108   :  { %s150_s30 = smov [#allocation5]  }
 0x109   :  { %93 = dma.smem_to_hbm %s150_s30, 16, %s195_s2, [#allocation4]  }
 0x10a   :  { %146 = dma.done.wait [#allocation4], 16  }
 0x10b   :  { %147 = vsyncadd [#allocation4], 4294967280 }
 0x10c   :  { %97 = sfence }
 0x10d   :  { %98 = vsyncpa [#allocation3], 1 }
 0x10e   :  { %99 = vsyncpa [#allocation4], 1 }

</bundles_post_ra>
